<compile_context>
chip_gen: v5e
topology: v5e:2x2
jax: 0.10.0
libtpu: 0.0.40
codegen_flags: <defaults>
</compile_context>

<pallas_src>
import jax
import jax.numpy as jnp
from jax.experimental import pallas as pl
from jax.experimental.pallas import tpu as pltpu

LANE = 128
SUBLANE = 8


def _round_up(n, m):
    return ((n + m - 1) // m) * m


def _poolnet_kernel(x_ref,
                    w_in_ref, b_in_ref,
                    w_h0_ref, b_h0_ref,
                    w_h1_ref, b_h1_ref,
                    w_out_ref, b_out_ref,
                    o_ref):
    """One batch tile: 3x (MXU matmul + bias + ReLU) + VPU matvec out layer."""
    x = x_ref[...]                                                # [TB, h_in] f32

    h = jnp.dot(x, w_in_ref[...], preferred_element_type=jnp.float32)
    h = jnp.maximum(h + b_in_ref[...], 0.0)                       # [TB, Hp]

    h = jnp.dot(h, w_h0_ref[...], preferred_element_type=jnp.float32)
    h = jnp.maximum(h + b_h0_ref[...], 0.0)

    h = jnp.dot(h, w_h1_ref[...], preferred_element_type=jnp.float32)
    h = jnp.maximum(h + b_h1_ref[...], 0.0)

    # Output layer has out_features == 1: VPU multiply + cross-lane reduce
    # instead of an N=1 MXU matmul. Store lane-dense [TB, 128] (col 0 = result).
    out_col = jnp.sum(h * w_out_ref[...], axis=-1, keepdims=True) + b_out_ref[...]
    o_ref[...] = jnp.broadcast_to(out_col, o_ref.shape).astype(o_ref.dtype)


def poolnet_forward(x, params, *, batch_tile=1024):
    """x: [B, h_in] float32. params: dict from init_poolnet_params (unpadded)."""
    B, h_in = x.shape
    H = params["w_in"].shape[1]
    Hp = _round_up(H, LANE)              # pad hidden width to full lanes

    def pad2(a, rows, cols):
        return jnp.pad(a, ((0, rows - a.shape[0]), (0, cols - a.shape[1])))

    # Zero-pad hidden width; math stays exact (padded activations remain 0).
    w_in = pad2(params["w_in"], h_in, Hp)
    b_in = pad2(params["b_in"], 1, Hp)
    w_h0 = pad2(params["w_h0"], Hp, Hp)
    b_h0 = pad2(params["b_h0"], 1, Hp)
    w_h1 = pad2(params["w_h1"], Hp, Hp)
    b_h1 = pad2(params["b_h1"], 1, Hp)
    w_out = pad2(params["w_out"].T, 1, Hp)        # row vector [1, Hp]
    b_out = params["b_out"]                        # [1, 1]

    # Batch tiling: TB multiple of 8, pad B up to a multiple of TB.
    TB = min(batch_tile, _round_up(B, SUBLANE))
    Bp = _round_up(B, TB)
    x_p = jnp.pad(x, ((0, Bp - B), (0, 0)))
    grid = (Bp // TB,)

    # Weights/biases: full-array blocks, constant index_map -> VMEM-resident.
    weight_spec = lambda a: pl.BlockSpec(a.shape, lambda i: (0, 0))

    flops = 2 * Bp * (h_in * Hp + 2 * Hp * Hp + Hp)
    bytes_accessed = 4 * (x_p.size + w_in.size + b_in.size + w_h0.size
                          + b_h0.size + w_h1.size + b_h1.size + w_out.size
                          + b_out.size + Bp * LANE)

    out_padded = pl.pallas_call(
        _poolnet_kernel,
        out_shape=jax.ShapeDtypeStruct((Bp, LANE), jnp.float32),
        grid=grid,
        in_specs=[
            pl.BlockSpec((TB, h_in), lambda i: (i, 0)),   # x: streamed per tile
            weight_spec(w_in), weight_spec(b_in),
            weight_spec(w_h0), weight_spec(b_h0),
            weight_spec(w_h1), weight_spec(b_h1),
            weight_spec(w_out), weight_spec(b_out),
        ],
        out_specs=pl.BlockSpec((TB, LANE), lambda i: (i, 0)),
        compiler_params=pltpu.CompilerParams(
            dimension_semantics=("parallel",)),
        cost_estimate=pl.CostEstimate(
            flops=int(flops), transcendentals=0,
            bytes_accessed=int(bytes_accessed)),
    )(x_p, w_in, b_in, w_h0, b_h0, w_h1, b_h1, w_out, b_out)

    # Lane-dense slab -> logical [B, 1] output.
    return out_padded[:B, :1]


def init_poolnet_params(key, h_in, h_h=64, nHidLayers=2):
    """Mirrors nn.Linear's U(-1/sqrt(fan_in), +1/sqrt(fan_in)) init.

    Weights stored as [in, out] (transposed vs. PyTorch) so the kernel does x @ W.
    """
    assert nHidLayers == 2, "kernel is specialized to nHidLayers=2"
    keys = jax.random.split(key, 8)

    def linear(kw, kb, fan_in, fan_out):
        bound = 1.0 / jnp.sqrt(jnp.float32(fan_in))
        w = jax.random.uniform(kw, (fan_in, fan_out), jnp.float32, -bound, bound)
        b = jax.random.uniform(kb, (1, fan_out), jnp.float32, -bound, bound)
        return w, b

    w_in, b_in = linear(keys[0], keys[1], h_in, h_h)
    w_h0, b_h0 = linear(keys[2], keys[3], h_h, h_h)
    w_h1, b_h1 = linear(keys[4], keys[5], h_h, h_h)
    w_out, b_out = linear(keys[6], keys[7], h_h, 1)
    return dict(w_in=w_in, b_in=b_in,
                w_h0=w_h0, b_h0=b_h0,
                w_h1=w_h1, b_h1=b_h1,
                w_out=w_out, b_out=b_out)


def poolnet_reference(x, p):
    """Pure-JAX reference for verification (unpadded params)."""
    h = jax.nn.relu(x @ p["w_in"] + p["b_in"])
    h = jax.nn.relu(h @ p["w_h0"] + p["b_h0"])
    h = jax.nn.relu(h @ p["w_h1"] + p["b_h1"])
    return h @ p["w_out"] + p["b_out"]


if __name__ == "__main__":
    B, H_IN, H_H = 8, 32, 64

    key = jax.random.PRNGKey(0)
    k_x, k_p = jax.random.split(key)
    x = jax.random.normal(k_x, (B, H_IN), dtype=jnp.float32)
    params = init_poolnet_params(k_p, H_IN, H_H, nHidLayers=2)

    out = poolnet_forward(x, params)
    out = jax.block_until_ready(out)

    ref = poolnet_reference(x, params)
    assert out.shape == (B, 1), out.shape
    assert jnp.allclose(out, ref, atol=1e-4, rtol=1e-4), "mismatch vs reference"

    print("KERNEL_OK")
</pallas_src>

<mosaic_0001>
module attributes {stable_mosaic.version = 11 : i64} {
  func.func @_poolnet_kernel(%arg0: i32, %arg1: memref<8x32xf32, #tpu.memory_space<vmem>>, %arg2: memref<32x128xf32, #tpu.memory_space<vmem>>, %arg3: memref<1x128xf32, #tpu.memory_space<vmem>>, %arg4: memref<128x128xf32, #tpu.memory_space<vmem>>, %arg5: memref<1x128xf32, #tpu.memory_space<vmem>>, %arg6: memref<128x128xf32, #tpu.memory_space<vmem>>, %arg7: memref<1x128xf32, #tpu.memory_space<vmem>>, %arg8: memref<1x128xf32, #tpu.memory_space<vmem>>, %arg9: memref<1x1xf32, #tpu.memory_space<vmem>>, %arg10: memref<8x128xf32, #tpu.memory_space<vmem>>) attributes {dimension_semantics = [#tpu.dimension_semantics<parallel>], iteration_bounds = array<i64: 1>, scalar_prefetch = 0 : i64, scratch_operands = 0 : i64, tpu.core_type = #tpu.core_type<tc>, window_params = [{transform_indices = @transform_0, window_bounds = array<i64: 8, 32>}, {pipeline_mode = #tpu.pipeline_mode<synchronous>, transform_indices = @transform_1, window_bounds = array<i64: 32, 128>}, {pipeline_mode = #tpu.pipeline_mode<synchronous>, transform_indices = @transform_2, window_bounds = array<i64: 1, 128>}, {pipeline_mode = #tpu.pipeline_mode<synchronous>, transform_indices = @transform_3, window_bounds = array<i64: 128, 128>}, {pipeline_mode = #tpu.pipeline_mode<synchronous>, transform_indices = @transform_4, window_bounds = array<i64: 1, 128>}, {pipeline_mode = #tpu.pipeline_mode<synchronous>, transform_indices = @transform_5, window_bounds = array<i64: 128, 128>}, {pipeline_mode = #tpu.pipeline_mode<synchronous>, transform_indices = @transform_6, window_bounds = array<i64: 1, 128>}, {pipeline_mode = #tpu.pipeline_mode<synchronous>, transform_indices = @transform_7, window_bounds = array<i64: 1, 128>}, {pipeline_mode = #tpu.pipeline_mode<synchronous>, transform_indices = @transform_8, window_bounds = array<i64: 1, 1>}, {transform_indices = @transform_9, window_bounds = array<i64: 8, 128>}]} {
    %c0 = arith.constant 0 : index
    %c0_0 = arith.constant 0 : index
    %0 = vector.load %arg1[%c0, %c0_0] : memref<8x32xf32, #tpu.memory_space<vmem>>, vector<8x32xf32>
    %c0_1 = arith.constant 0 : index
    %c0_2 = arith.constant 0 : index
    %1 = vector.load %arg2[%c0_1, %c0_2] : memref<32x128xf32, #tpu.memory_space<vmem>>, vector<32x128xf32>
    %cst = arith.constant dense<0.000000e+00> : vector<8x128xf32>
    %2 = tpu.matmul %0, %1, %cst {dimension_numbers = #tpu.dot_dimension_numbers<[1], [0], [0], [1], [0, 0, 1, 1], [], []>} : vector<8x32xf32>, vector<32x128xf32>, vector<8x128xf32> -> vector<8x128xf32>
    %c0_3 = arith.constant 0 : index
    %c0_4 = arith.constant 0 : index
    %3 = vector.load %arg3[%c0_3, %c0_4] : memref<1x128xf32, #tpu.memory_space<vmem>>, vector<1x128xf32>
    %4 = vector.broadcast %3 : vector<1x128xf32> to vector<8x128xf32>
    %5 = arith.addf %2, %4 : vector<8x128xf32>
    %cst_5 = arith.constant 0.000000e+00 : f32
    %6 = vector.broadcast %cst_5 : f32 to vector<8x128xf32>
    %7 = arith.maximumf %5, %6 : vector<8x128xf32>
    %c0_6 = arith.constant 0 : index
    %c0_7 = arith.constant 0 : index
    %8 = vector.load %arg4[%c0_6, %c0_7] : memref<128x128xf32, #tpu.memory_space<vmem>>, vector<128x128xf32>
    %cst_8 = arith.constant dense<0.000000e+00> : vector<8x128xf32>
    %9 = tpu.matmul %7, %8, %cst_8 {dimension_numbers = #tpu.dot_dimension_numbers<[1], [0], [0], [1], [0, 0, 1, 1], [], []>} : vector<8x128xf32>, vector<128x128xf32>, vector<8x128xf32> -> vector<8x128xf32>
    %c0_9 = arith.constant 0 : index
    %c0_10 = arith.constant 0 : index
    %10 = vector.load %arg5[%c0_9, %c0_10] : memref<1x128xf32, #tpu.memory_space<vmem>>, vector<1x128xf32>
    %11 = vector.broadcast %10 : vector<1x128xf32> to vector<8x128xf32>
    %12 = arith.addf %9, %11 : vector<8x128xf32>
    %cst_11 = arith.constant 0.000000e+00 : f32
    %13 = vector.broadcast %cst_11 : f32 to vector<8x128xf32>
    %14 = arith.maximumf %12, %13 : vector<8x128xf32>
    %c0_12 = arith.constant 0 : index
    %c0_13 = arith.constant 0 : index
    %15 = vector.load %arg6[%c0_12, %c0_13] : memref<128x128xf32, #tpu.memory_space<vmem>>, vector<128x128xf32>
    %cst_14 = arith.constant dense<0.000000e+00> : vector<8x128xf32>
    %16 = tpu.matmul %14, %15, %cst_14 {dimension_numbers = #tpu.dot_dimension_numbers<[1], [0], [0], [1], [0, 0, 1, 1], [], []>} : vector<8x128xf32>, vector<128x128xf32>, vector<8x128xf32> -> vector<8x128xf32>
    %c0_15 = arith.constant 0 : index
    %c0_16 = arith.constant 0 : index
    %17 = vector.load %arg7[%c0_15, %c0_16] : memref<1x128xf32, #tpu.memory_space<vmem>>, vector<1x128xf32>
    %18 = vector.broadcast %17 : vector<1x128xf32> to vector<8x128xf32>
    %19 = arith.addf %16, %18 : vector<8x128xf32>
    %cst_17 = arith.constant 0.000000e+00 : f32
    %20 = vector.broadcast %cst_17 : f32 to vector<8x128xf32>
    %21 = arith.maximumf %19, %20 : vector<8x128xf32>
    %c0_18 = arith.constant 0 : index
    %c0_19 = arith.constant 0 : index
    %22 = vector.load %arg8[%c0_18, %c0_19] : memref<1x128xf32, #tpu.memory_space<vmem>>, vector<1x128xf32>
    %23 = vector.broadcast %22 : vector<1x128xf32> to vector<8x128xf32>
    %24 = arith.mulf %21, %23 : vector<8x128xf32>
    %cst_20 = arith.constant dense<0.000000e+00> : vector<8xf32>
    %25 = vector.multi_reduction <add>, %24, %cst_20 [1] : vector<8x128xf32> to vector<8xf32>
    %26 = vector.shape_cast %25 : vector<8xf32> to vector<8x1xf32>
    %c0_21 = arith.constant 0 : index
    %c0_22 = arith.constant 0 : index
    %27 = vector.load %arg9[%c0_21, %c0_22] : memref<1x1xf32, #tpu.memory_space<vmem>>, vector<1x1xf32>
    %28 = vector.broadcast %27 : vector<1x1xf32> to vector<8x1xf32>
    %29 = arith.addf %26, %28 : vector<8x1xf32>
    %30 = vector.shape_cast %29 : vector<8x1xf32> to vector<8x1xf32>
    %31 = vector.broadcast %30 : vector<8x1xf32> to vector<8x128xf32>
    %c0_23 = arith.constant 0 : index
    %c0_24 = arith.constant 0 : index
    %32 = vector.load %arg10[%c0_23, %c0_24] : memref<8x128xf32, #tpu.memory_space<vmem>>, vector<8x128xf32>
    tpu.vector_store %arg10[%c0_23, %c0_24], %31 {strides = array<i32>} : memref<8x128xf32, #tpu.memory_space<vmem>>, vector<8x128xf32>,
    return
  }
  func.func @transform_0(%arg0: i32) -> (i32, i32) {
    %c0_i32 = arith.constant 0 : i32
    %c0_i32_0 = arith.constant 0 : i32
    return %arg0, %c0_i32 : i32, i32
  }
  func.func @transform_1(%arg0: i32) -> (i32, i32) {
    %c0_i32 = arith.constant 0 : i32
    %c0_i32_0 = arith.constant 0 : i32
    %c0_i32_1 = arith.constant 0 : i32
    return %c0_i32, %c0_i32_0 : i32, i32
  }
  func.func @transform_2(%arg0: i32) -> (i32, i32) {
    %c0_i32 = arith.constant 0 : i32
    %c0_i32_0 = arith.constant 0 : i32
    %c0_i32_1 = arith.constant 0 : i32
    return %c0_i32, %c0_i32_0 : i32, i32
  }
  func.func @transform_3(%arg0: i32) -> (i32, i32) {
    %c0_i32 = arith.constant 0 : i32
    %c0_i32_0 = arith.constant 0 : i32
    %c0_i32_1 = arith.constant 0 : i32
    return %c0_i32, %c0_i32_0 : i32, i32
  }
  func.func @transform_4(%arg0: i32) -> (i32, i32) {
    %c0_i32 = arith.constant 0 : i32
    %c0_i32_0 = arith.constant 0 : i32
    %c0_i32_1 = arith.constant 0 : i32
    return %c0_i32, %c0_i32_0 : i32, i32
  }
  func.func @transform_5(%arg0: i32) -> (i32, i32) {
    %c0_i32 = arith.constant 0 : i32
    %c0_i32_0 = arith.constant 0 : i32
    %c0_i32_1 = arith.constant 0 : i32
    return %c0_i32, %c0_i32_0 : i32, i32
  }
  func.func @transform_6(%arg0: i32) -> (i32, i32) {
    %c0_i32 = arith.constant 0 : i32
    %c0_i32_0 = arith.constant 0 : i32
    %c0_i32_1 = arith.constant 0 : i32
    return %c0_i32, %c0_i32_0 : i32, i32
  }
  func.func @transform_7(%arg0: i32) -> (i32, i32) {
    %c0_i32 = arith.constant 0 : i32
    %c0_i32_0 = arith.constant 0 : i32
    %c0_i32_1 = arith.constant 0 : i32
    return %c0_i32, %c0_i32_0 : i32, i32
  }
  func.func @transform_8(%arg0: i32) -> (i32, i32) {
    %c0_i32 = arith.constant 0 : i32
    %c0_i32_0 = arith.constant 0 : i32
    %c0_i32_1 = arith.constant 0 : i32
    return %c0_i32, %c0_i32_0 : i32, i32
  }
  func.func @transform_9(%arg0: i32) -> (i32, i32) {
    %c0_i32 = arith.constant 0 : i32
    %c0_i32_0 = arith.constant 0 : i32
    return %arg0, %c0_i32 : i32, i32
  }
}

</mosaic_0001>

<bundles_post_ra>
// kernel: tpu_custom_call.1
= control target key start
LH: loop header
LB: loop body
LE: loop exit
PB: predicated region body
PF: predicated region fallthrough
CT: control target
= control target key end

     0   :  { %s480_s0 = inlined_call_operand.hbm [shape: f32[8,32], index: 0, kind: input, shape index: {}]   ;;  %s481_s1 = inlined_call_operand.hbm [shape: f32[32,128], index: 1, kind: input, shape index: {}]   ;;  %s482_s2 = inlined_call_operand.vmem [shape: f32[1,128], index: 2, kind: input, shape index: {}]   ;;  %s483_s3 = inlined_call_operand.hbm [shape: f32[128,128], index: 3, kind: input, shape index: {}]   ;;  %s484_s4 = inlined_call_operand.vmem [shape: f32[1,128], index: 4, kind: input, shape index: {}]   ;;  %s485_s5 = inlined_call_operand.hbm [shape: f32[128,128], index: 5, kind: input, shape index: {}]   ;;  %s486_s6 = inlined_call_operand.vmem [shape: f32[1,128], index: 6, kind: input, shape index: {}]   ;;  %s487_s7 = inlined_call_operand.vmem [shape: f32[1,128], index: 7, kind: input, shape index: {}]   ;;  %s488_s8 = inlined_call_operand.<no memory space> [shape: f32[1,1], index: 8, kind: input, shape index: {}]   ;;  %s489_s9 = inlined_call_operand.hbm [shape: f32[8,128], index: 9, kind: output, shape index: {}]  }
   0x1   :  { %v14_v0 = vstv %s488_s8 }
   0x2   :  { %15 = vst [vmem:[#allocation2] sm:$0x1] %v14_v0 }
   0x3   :  { %16 = vsyncpa [#allocation4], 0 }
   0x4   :  { %17 = vsyncpa [#allocation7], 0 }
   0x5   :  { %18 = vsyncpa [#allocation10], 0  ;;  %s35_s13 = sshll.u32 %s481_s1, 4  ;;  %s36_s13 = int_to_ptr.hbm [resolvable:$true] %s35_s13 }
   0x6   :  { %19 = vsyncpa [#allocation5], 0  ;;  %s392_s14 = smov [#allocation6]   ;;  %s25_s18 = sshll.u32 %s480_s0, 4  ;;  %s26_s18 = int_to_ptr.hbm [resolvable:$true] %s25_s18 }
   0x7   :  { %s37_s15 = sshll.u32 %s392_s14, 4  ;;  %s393_s19 = smov 128   ;;  %s38_s15 = int_to_ptr.vmem [resolvable:$true] %s37_s15 }
   0x8   :  { %s394_s20 = smov 8   ;;  %s395_s8 = smov [#allocation3]  }
   0x9   :  { %43 = dma.hbm_to_vmem [thread:$0]  %s36_s13, 512, %s38_s15, [#allocation7], %s393_s19, %s393_s19, %s394_s20  }
   0xa   :  { %s27_s21 = sshll.u32 %s395_s8, 4  ;;  %s50_s24 = sshll.u32 %s483_s3, 4  ;;  %s28_s21 = int_to_ptr.vmem [resolvable:$true] %s27_s21  ;;  %s51_s24 = int_to_ptr.hbm [resolvable:$true] %s50_s24 }
   0xb   :  { %30 = dma.hbm_to_vmem [thread:$0]  %s26_s18, 128, %s28_s21, [#allocation4]  }
   0xc   :  { %s65_s26 = sshll.u32 %s485_s5, 4  ;;  %s396_s27 = smov [#allocation8]   ;;  %s66_s26 = int_to_ptr.hbm [resolvable:$true] %s65_s26 }
   0xd   :  { %s52_s28 = sshll.u32 %s396_s27, 4  ;;  %s397_s0 = smov [#allocation9]   ;;  %s53_s28 = int_to_ptr.vmem [resolvable:$true] %s52_s28 }
   0xe   :  { %58 = dma.hbm_to_vmem [thread:$0]  %s51_s24, 2048, %s53_s28, [#allocation7], %s393_s19, %s393_s19, %s394_s20  }
   0xf   :  { %s67_s29 = sshll.u32 %s397_s0, 4  ;;  %s68_s29 = int_to_ptr.vmem [resolvable:$true] %s67_s29 }
  0x10   :  { %73 = dma.hbm_to_vmem [thread:$0]  %s66_s26, 2048, %s68_s29, [#allocation10], %s393_s19, %s393_s19, %s394_s20  }
  0x11   :  { %384 = dma.done.wait [#allocation4], 128  }
  0x12   :  { %385 = vsyncadd [#allocation4], 4294967168 }
  0x13   :  { %386 = dma.done.wait [#allocation7], 2560  }
  0x14   :  { %387 = vsyncadd [#allocation7], 4294964736 }
  0x15   :  { %388 = dma.done.wait [#allocation10], 2048  }
  0x16   :  { %389 = vsyncadd [#allocation10], 4294965248  ;;  %v100_v1 = vld [vmem:[#allocation6 + $0x18] sm:$0xff]  ;;  %v99_v2 = vld [vmem:[#allocation6 + $0x10] sm:$0xff]  ;;  %vm105_vm0 = vcmask 261120   ;;  %v398_v52 = vmov 0  }
  0x17   :  { %121 = vmatpush.msra.mxu0 %v100_v1  ;;  %v145_v3 = vld [vmem:[#allocation8 + $0x78] sm:$0xff]  ;;  %v98_v4 = vld [vmem:[#allocation6 + $0x8] sm:$0xff]  ;;  %v144_v5 = vld [vmem:[#allocation8 + $0x70] sm:$0xff]  ;;  %258 = vset.pattern.permute.xlu0 %v398_v52 }
  0x18   :  { %150 = vmatpush.msra.mxu1 %v145_v3  ;;  %v143_v6 = vld [vmem:[#allocation8 + $0x68] sm:$0xff]  ;;  %v97_v7 = vld [vmem:[#allocation6] sm:$0xff]  ;;  %v96_v8 = vld [vmem:[#allocation3] sm:$0xff] }
  0x19   :  { %122 = vmatpush.msra.mxu0 %v99_v2  ;;  %v142_v9 = vld [vmem:[#allocation8 + $0x60] sm:$0xff]  ;;  %v141_v10 = vld [vmem:[#allocation8 + $0x58] sm:$0xff]  ;;  %v140_v11 = vld [vmem:[#allocation8 + $0x50] sm:$0xff] }
  0x1a   :  { %151 = vmatpush.msra.mxu1 %v144_v5  ;;  %v139_v12 = vld [vmem:[#allocation8 + $0x48] sm:$0xff]  ;;  %v138_v13 = vld [vmem:[#allocation8 + $0x40] sm:$0xff]  ;;  %v137_v14 = vld [vmem:[#allocation8 + $0x38] sm:$0xff] }
  0x1b   :  { %123 = vmatpush.msra.mxu0 %v98_v4  ;;  %v136_v15 = vld [vmem:[#allocation8 + $0x30] sm:$0xff]  ;;  %v135_v16 = vld [vmem:[#allocation8 + $0x28] sm:$0xff]  ;;  %v134_v17 = vld [vmem:[#allocation8 + $0x20] sm:$0xff] }
  0x1c   :  { %152 = vmatpush.msra.mxu1 %v143_v6  ;;  %v133_v18 = vld [vmem:[#allocation8 + $0x18] sm:$0xff]  ;;  %v132_v19 = vld [vmem:[#allocation8 + $0x10] sm:$0xff]  ;;  %v131_v20 = vld [vmem:[#allocation8 + $0x8] sm:$0xff] }
  0x1d   :  { %124 = vmatpush.msra.mxu0 %v97_v7  ;;  %v130_v21 = vld [vmem:[#allocation8] sm:$0xff]  ;;  %v186_v22 = vld [vmem:[#allocation9 + $0x78] sm:$0xff]  ;;  %v185_v23 = vld [vmem:[#allocation9 + $0x70] sm:$0xff] }
  0x1e   :  { %249 = vmatmul.msk.f32.vlgmr.msra.gmra.mxu0 %vm105_vm0, %v96_v8  ;;  %153 = vmatpush.msra.mxu1 %v142_v9  ;;  %v184_v24 = vld [vmem:[#allocation9 + $0x68] sm:$0xff]  ;;  %v183_v25 = vld [vmem:[#allocation9 + $0x60] sm:$0xff]  ;;  %v182_v26 = vld [vmem:[#allocation9 + $0x58] sm:$0xff] }
  0x1f   :  { %191 = vmatpush.msra.mxu2 %v186_v22  ;;  %v181_v27 = vld [vmem:[#allocation9 + $0x50] sm:$0xff]  ;;  %v180_v28 = vld [vmem:[#allocation9 + $0x48] sm:$0xff]  ;;  %v179_v29 = vld [vmem:[#allocation9 + $0x40] sm:$0xff] }
  0x20   :  { %154 = vmatpush.msra.mxu1 %v141_v10  ;;  %v178_v30 = vld [vmem:[#allocation9 + $0x38] sm:$0xff]  ;;  %v177_v31 = vld [vmem:[#allocation9 + $0x30] sm:$0xff]  ;;  %v176_v32 = vld [vmem:[#allocation9 + $0x28] sm:$0xff] }
  0x21   :  { %192 = vmatpush.msra.mxu2 %v185_v23  ;;  %v175_v33 = vld [vmem:[#allocation9 + $0x20] sm:$0xff]  ;;  %v174_v34 = vld [vmem:[#allocation9 + $0x18] sm:$0xff]  ;;  %v259_v35 = vld [vmem:[%s482_s2] ss:$0 sm:$0xff] }
  0x22   :  { %155 = vmatpush.msra.mxu1 %v140_v11  ;;  %v173_v39 = vld [vmem:[#allocation9 + $0x10] sm:$0xff]  ;;  %v172_v40 = vld [vmem:[#allocation9 + $0x8] sm:$0xff]  ;;  %v171_v41 = vld [vmem:[#allocation9] sm:$0xff] }
  0x23   :  { %193 = vmatpush.msra.mxu2 %v184_v24  ;;  %v260_v42 = vld [vmem:[%s484_s4] ss:$0 sm:$0xff]  ;;  %s399_s4 = smov [#allocation11]  }
  0x24   :  { %156 = vmatpush.msra.mxu1 %v139_v12  ;;  %v261_v46 = vld [vmem:[%s486_s6] ss:$0 sm:$0xff]  ;;  %s235_s14 = sshll.u32 %s399_s4, 4  ;;  %s237_s6 = sshll.u32 %s489_s9, 4  ;;  %s236_s14 = int_to_ptr.vmem [resolvable:$true] %s235_s14  ;;  %s238_s6 = int_to_ptr.hbm [resolvable:$true] %s237_s6 }
  0x25   :  { %194 = vmatpush.msra.mxu2 %v183_v25  ;;  %v262_v49 = vld [vmem:[%s487_s7] ss:$0 sm:$0xff] }
  0x26   :  { %157 = vmatpush.msra.mxu1 %v138_v13  ;;  %v263_v53 = vld [vmem:[#allocation2] ss:$0 sm:$0xff] }
  0x27   :  { %195 = vmatpush.msra.mxu2 %v182_v26 }
  0x28   :  { %158 = vmatpush.msra.mxu1 %v137_v14 }
  0x29   :  { %196 = vmatpush.msra.mxu2 %v181_v27 }
  0x2a   :  { %159 = vmatpush.msra.mxu1 %v136_v15 }
  0x2b   :  { %197 = vmatpush.msra.mxu2 %v180_v28 }
  0x2c   :  { %160 = vmatpush.msra.mxu1 %v135_v16 }
  0x2d   :  { %198 = vmatpush.msra.mxu2 %v179_v29 }
  0x2e   :  { %161 = vmatpush.msra.mxu1 %v134_v17 }
  0x2f   :  { %199 = vmatpush.msra.mxu2 %v178_v30 }
  0x30   :  { %162 = vmatpush.msra.mxu1 %v133_v18 }
  0x31   :  { %200 = vmatpush.msra.mxu2 %v177_v31 }
  0x32   :  { %163 = vmatpush.msra.mxu1 %v132_v19 }
  0x33   :  { %201 = vmatpush.msra.mxu2 %v176_v32 }
  0x34   :  { %164 = vmatpush.msra.mxu1 %v131_v20 }
  0x35   :  { %202 = vmatpush.msra.mxu2 %v175_v33 }
  0x36   :  { %165 = vmatpush.msra.mxu1 %v130_v21 }
  0x37   :  { %203 = vmatpush.msra.mxu2 %v174_v34 }
  0x39   :  { %204 = vmatpush.msra.mxu2 %v173_v39 }
  0x3b   :  { %205 = vmatpush.msra.mxu2 %v172_v40 }
  0x3d   :  { %206 = vmatpush.msra.mxu2 %v171_v41 }
  0x9b   :  { %v126_v36 = vpop.f32.mrf.mxu0 }
  0x9c   :  { %v127_v37 = vadd.f32 %v259_v35, %v126_v36 }
  0x9e   :  { %v129_v38 = vmax.f32 %v127_v37, 0.0 }
  0xa0   :  { %166 = vmatmul.f32.vlgmr.msra.gmra.mxu1 %v129_v38 }
 0x11d   :  { %v167_v43 = vpop.f32.mrf.mxu1 }
 0x11e   :  { %v168_v44 = vadd.f32 %v260_v42, %v167_v43 }
 0x120   :  { %v170_v45 = vmax.f32 %v168_v44, 0.0 }
 0x122   :  { %207 = vmatmul.f32.vlgmr.msra.gmra.mxu2 %v170_v45 }
 0x1a5   :  { %v208_v47 = vpop.f32.mrf.mxu2 }
 0x1a6   :  { %v209_v48 = vadd.f32 %v261_v46, %v208_v47 }
 0x1a8   :  { %v211_v50 = vmax.f32 %v209_v48, 0.0 }
 0x1aa   :  { %v216_v51 = vmul.f32 %v262_v49, %v211_v50 }
 0x1ac   :  { %217 = vadd.xlane.f32.xlu0 %v216_v51 }
 0x21f   :  { %v218_v54 = vpop.xlane.xlu0 %217 }
 0x220   :  { %v223_v55 = vadd.f32 %v263_v53, %v218_v54 }
 0x222   :  { %226 = vperm.xlu0 %258, %v223_v55  }
 0x294   :  { %v227_v56 = vpop.permute.xlu0 %226 }
 0x295   :  { %229 = vst [vmem:[#allocation11] sm:$0xff] %v227_v56 }
 0x296   :  { %240 = dma.vmem_to_hbm [thread:$0]  %s236_s14, 128, %s238_s6, [#allocation5]  }
 0x297   :  { %390 = dma.done.wait [#allocation5], 128  }
 0x298   :  { %391 = vsyncadd [#allocation5], 4294967168 }
 0x299   :  { %245 = vsyncpa [#allocation4], 1 }
 0x29a   :  { %246 = vsyncpa [#allocation7], 1 }
 0x29b   :  { %247 = vsyncpa [#allocation10], 1 }
 0x29c   :  { %248 = vsyncpa [#allocation5], 1 }

</bundles_post_ra>
